<compile_context>
chip_gen: v7x
topology: tpu7x:2x2x1
jax: 0.10.0
libtpu: 0.0.40
codegen_flags: <defaults>
</compile_context>

<pallas_src>
import functools
import math

import jax
import jax.numpy as jnp
from jax.experimental import pallas as pl
from jax.experimental.pallas import tpu as pltpu


def _round_up(x, m):
    return ((x + m - 1) // m) * m


def _label_smoothing_kernel(x_ref, o_ref, *, epsilon, inv_k):
    # VPU elementwise scale + bias on one (TM, TK) VMEM tile.
    x = x_ref[...]
    out = (1.0 - epsilon) * x + (epsilon * inv_k)
    o_ref[...] = out.astype(o_ref.dtype)


def label_smoothing(inputs, epsilon=0.1, *, block_rows=512, block_k=2048):
    """Pallas implementation of (1-eps)*inputs + eps/K, K = last-dim size."""
    orig_shape = inputs.shape
    dtype = inputs.dtype
    K = orig_shape[-1]
    rows = math.prod(orig_shape[:-1]) if len(orig_shape) > 1 else 1
    x2 = inputs.reshape(rows, K)

    # Sublane packing: 8 rows/vreg for 32-bit, 16 for bf16, 32 for 8-bit.
    itemsize = jnp.dtype(dtype).itemsize
    sub = 8 * max(1, 4 // itemsize)

    # Lane-dense last-dim tile (multiple of 128) and sublane-aligned row tile,
    # clamped so tiny inputs don't get padded to the full default tile size.
    tk = min(_round_up(block_k, 128), _round_up(K, 128))
    tm = min(_round_up(block_rows, sub), _round_up(rows, sub))

    rows_p = _round_up(rows, tm)
    k_p = _round_up(K, tk)
    padded = (rows_p != rows) or (k_p != K)
    if padded:
        x2 = jnp.pad(x2, ((0, rows_p - rows), (0, k_p - K)))

    kernel = functools.partial(
        _label_smoothing_kernel, epsilon=float(epsilon), inv_k=1.0 / float(K)
    )

    out = pl.pallas_call(
        kernel,
        out_shape=jax.ShapeDtypeStruct((rows_p, k_p), dtype),
        grid=(rows_p // tm, k_p // tk),
        in_specs=[pl.BlockSpec((tm, tk), lambda i, j: (i, j))],
        out_specs=pl.BlockSpec((tm, tk), lambda i, j: (i, j)),
        compiler_params=pltpu.CompilerParams(
            dimension_semantics=("parallel", "arbitrary"),
            vmem_limit_bytes=32 << 20,
        ),
    )(x2)

    if padded:
        out = out[:rows, :K]
    return out.reshape(orig_shape)


def _reference(x, eps):
    K = x.shape[-1]
    return ((1.0 - eps) * x.astype(jnp.float32) + eps / K).astype(x.dtype)


if __name__ == "__main__":
    key = jax.random.PRNGKey(0)
    eps = 0.1

    # 1) Small demo shape matching the module's typical (batch, seq, vocab).
    B, S, K = 2, 8, 32
    x = jax.random.normal(key, (B, S, K), dtype=jnp.float32)
    out = jax.block_until_ready(label_smoothing(x, epsilon=eps))
    ref = _reference(x, eps)
    assert out.shape == x.shape and out.dtype == x.dtype
    assert jnp.allclose(out, ref, atol=1e-6, rtol=1e-6)

    # 2) Irregular multi-tile shape: exercises row/vocab padding + 2-D grid.
    k2 = jax.random.PRNGKey(1)
    x2 = jax.random.normal(k2, (3, 520, 257), dtype=jnp.float32)
    out2 = jax.block_until_ready(label_smoothing(x2, epsilon=eps))
    ref2 = _reference(x2, eps)
    assert out2.shape == x2.shape and out2.dtype == x2.dtype
    assert jnp.allclose(out2, ref2, atol=1e-6, rtol=1e-6)

    # 3) bf16 path: explicit astype keeps the store dtype-correct.
    k3 = jax.random.PRNGKey(2)
    x3 = jax.random.normal(k3, (2, 8, 32), dtype=jnp.bfloat16)
    out3 = jax.block_until_ready(label_smoothing(x3, epsilon=eps))
    ref3 = _reference(x3, eps)
    assert out3.shape == x3.shape and out3.dtype == x3.dtype
    assert jnp.allclose(
        out3.astype(jnp.float32), ref3.astype(jnp.float32), atol=2e-2, rtol=2e-2
    )

    print("KERNEL_OK")
</pallas_src>

<mosaic_0001>
module attributes {stable_mosaic.version = 11 : i64} {
  func.func @_label_smoothing_kernel(%arg0: i32, %arg1: i32, %arg2: memref<16x128xf32, #tpu.memory_space<vmem>>, %arg3: memref<16x128xf32, #tpu.memory_space<vmem>>) attributes {dimension_semantics = [#tpu.dimension_semantics<parallel>, #tpu.dimension_semantics<arbitrary>], iteration_bounds = array<i64: 1, 1>, scalar_prefetch = 0 : i64, scratch_operands = 0 : i64, tpu.core_type = #tpu.core_type<tc>, window_params = [{transform_indices = @transform_0, window_bounds = array<i64: 16, 128>}, {transform_indices = @transform_1, window_bounds = array<i64: 16, 128>}]} {
    %c0 = arith.constant 0 : index
    %c0_0 = arith.constant 0 : index
    %0 = vector.load %arg2[%c0, %c0_0] : memref<16x128xf32, #tpu.memory_space<vmem>>, vector<16x128xf32>
    %cst = arith.constant 0.899999976 : f32
    %1 = vector.broadcast %cst : f32 to vector<16x128xf32>
    %2 = arith.mulf %1, %0 : vector<16x128xf32>
    %cst_1 = arith.constant 3.125000e-03 : f32
    %3 = vector.broadcast %cst_1 : f32 to vector<16x128xf32>
    %4 = arith.addf %2, %3 : vector<16x128xf32>
    %c0_2 = arith.constant 0 : index
    %c0_3 = arith.constant 0 : index
    %5 = vector.load %arg3[%c0_2, %c0_3] : memref<16x128xf32, #tpu.memory_space<vmem>>, vector<16x128xf32>
    tpu.vector_store %arg3[%c0_2, %c0_3], %4 {strides = array<i32>} : memref<16x128xf32, #tpu.memory_space<vmem>>, vector<16x128xf32>,
    return
  }
  func.func @transform_0(%arg0: i32, %arg1: i32) -> (i32, i32) {
    %c0_i32 = arith.constant 0 : i32
    return %arg0, %arg1 : i32, i32
  }
  func.func @transform_1(%arg0: i32, %arg1: i32) -> (i32, i32) {
    %c0_i32 = arith.constant 0 : i32
    return %arg0, %arg1 : i32, i32
  }
}

</mosaic_0001>

<bundles_post_ra>
// kernel: tpu_custom_call.1
= control target key start
LH: loop header
LB: loop body
LE: loop exit
PB: predicated region body
PF: predicated region fallthrough
CT: control target
= control target key end

     0   :  { %6 = vsyncpa [#allocation3], 0  ;;  %s144_s0 = inlined_call_operand.hbm [shape: f32[16,128], index: 0, kind: input, shape index: {}]   ;;  %s145_s1 = inlined_call_operand.hbm [shape: f32[16,128], index: 1, kind: output, shape index: {}]  }
   0x1   :  { %7 = vsyncpa [#allocation4], 0  ;;  %s100_s6 = smov [#allocation2]   ;;  %s52_s10 = scalar_lea.hbm %s144_s0, 256 }
   0x2   :  { %s13_s7 = sshll.u32 %s100_s6, 4  ;;  %p53_p0 = scmp.ne.s32.totalorder %s144_s0, %s52_s10  ;;  %s14_s7 = int_to_ptr.vmem [resolvable:$true] %s13_s7 }
   0x3   :  { %p56_p1 = scmp.lt.u32.totalorder %s52_s10, %s144_s0 }
   0x5   :  { %p58_p2 = pnand %p56_p1, %p53_p0 }
   0x7   :  { %61 = shalt.err (!%p58_p2)
}
   0x8   :  { %s62_s15 = scalar_lea.vmem %s14_s7, 256  ;;  %p67_p4 = scmp.lt.s32.totalorder %s14_s7, %s14_s7 }
   0x9   :  { %p63_p3 = scmp.ne.s32.totalorder %s14_s7, %s62_s15  ;;  %p68_p5 = scmp.lt.s32.totalorder %s62_s15, %s62_s15 }
   0xb   :  { %p69_p6 = por %p68_p5, %p67_p4 }
   0xd   :  { %p70_p7 = pnand %p69_p6, %p63_p3 }
   0xf   :  { %73 = shalt.err (!%p70_p7)
}
  0x10   :  { %s101_s16 = smov 128   ;;  %s102_s17 = smov 8  }
  0x11   :  { %19 = dma.hbm_to_vmem [thread:$0]  %s144_s0, 256, %s14_s7, [#allocation3], %s101_s16, %s101_s16, %s102_s17  }
  0x12   :  { %96 = dma.done.wait [#allocation3], 256  }
  0x13   :  { %97 = vsyncadd [#allocation3], 4294967040  ;;  %v23_v0 = vld [vmem:[#allocation2] sm:$0xff]  ;;  %v24_v1 = vld [vmem:[#allocation2 + $0x8] sm:$0xff]  ;;  %s103_s20 = smov [#allocation5]  }
  0x14   :  { %s36_s21 = sshll.u32 %s103_s20, 4  ;;  %v25_v2 = vmul.f32 0.9, %v23_v0  ;;  %v26_v3 = vmul.f32 0.9, %v24_v1  ;;  %s37_s21 = int_to_ptr.vmem [resolvable:$true] %s36_s21 }
  0x15   :  { %s74_s22 = scalar_lea.vmem %s37_s21, 256  ;;  %p79_p9 = scmp.lt.s32.totalorder %s37_s21, %s37_s21 }
  0x16   :  { %v27_v4 = vadd.f32 0.003125, %v25_v2  ;;  %v28_v5 = vadd.f32 0.003125, %v26_v3  ;;  %p75_p8 = scmp.ne.s32.totalorder %s37_s21, %s74_s22  ;;  %p80_p10 = scmp.lt.s32.totalorder %s74_s22, %s74_s22 }
  0x18   :  { %29 = vst [vmem:[#allocation5] sm:$0xff] %v27_v4  ;;  %30 = vst [vmem:[#allocation5 + $0x8] sm:$0xff] %v28_v5  ;;  %p81_p11 = por %p80_p10, %p79_p9 }
  0x1a   :  { %p82_p12 = pnand %p81_p11, %p75_p8 }
  0x1c   :  { %85 = shalt.err (!%p82_p12)
}
  0x1d   :  { %s86_s24 = scalar_lea.hbm %s145_s1, 256 }
  0x1e   :  { %p87_p13 = scmp.ne.s32.totalorder %s145_s1, %s86_s24  ;;  %p90_p0 = scmp.lt.u32.totalorder %s86_s24, %s145_s1 }
  0x20   :  { %p92_p1 = pnand %p90_p0, %p87_p13 }
  0x22   :  { %95 = shalt.err (!%p92_p1)
}
  0x23   :  { %42 = dma.vmem_to_hbm [thread:$0]  %s37_s21, 256, %s145_s1, [#allocation4], %s101_s16, %s101_s16, %s102_s17  }
  0x24   :  { %98 = dma.done.wait [#allocation4], 256  }
  0x25   :  { %99 = vsyncadd [#allocation4], 4294967040 }
  0x26   :  { %46 = vsyncpa [#allocation3], 1 }
  0x27   :  { %47 = vsyncpa [#allocation4], 1 }

</bundles_post_ra>
